<compile_context>
chip_gen: v7x
topology: tpu7x:2x2x1
jax: 0.10.0
libtpu: 0.0.40
codegen_flags: <defaults>
</compile_context>

<pallas_src>
import functools

import jax
import jax.numpy as jnp
from jax.experimental import pallas as pl
from jax.experimental.pallas import tpu as pltpu

_BN_EPS = 1e-5
_LANE = 128
_ROW_TILE_CAP = 512


def _round_up(x, m):
    return (x + m - 1) // m * m


# ----------------------------------------------------------------------------
# Plain-JAX grouping glue (data-dependent gather / sort -> no clean Pallas fit)
# ----------------------------------------------------------------------------
def square_distance(src, dst):
    # src: [B, N, C], dst: [B, M, C] -> [B, N, M]
    dist = -2.0 * jnp.matmul(src, jnp.swapaxes(dst, 1, 2))
    dist = dist + jnp.sum(src ** 2, -1)[:, :, None]
    dist = dist + jnp.sum(dst ** 2, -1)[:, None, :]
    return dist


def index_points(points, idx):
    # points: [B, N, C], idx: [B, ...] -> [B, ..., C]
    return jax.vmap(lambda p, i: p[i])(points, idx)


def index_points_kbs(points, idx):
    # points: [B, N, C], idx: [B, S, K] -> gathered directly in (K, B, S, C) order
    # so the MLP kernel needs no host-side transpose of the grouped slab.
    idx_kbs = jnp.transpose(idx, (2, 0, 1))                        # [K, B, S] (tiny)
    return jax.vmap(lambda p, i: p[i], in_axes=(0, 1), out_axes=1)(points, idx_kbs)


def farthest_point_sample(xyz, npoint):
    # xyz: [B, N, 3] -> [B, npoint] int32
    # TODO(synk): PyTorch seeds `farthest` with torch.randint; use 0 deterministically.
    B, N, _ = xyz.shape

    def body(i, state):
        distance, farthest, centroids = state
        centroids = centroids.at[:, i].set(farthest)
        centroid = jnp.take_along_axis(xyz, farthest[:, None, None], axis=1)  # [B,1,3]
        dist = jnp.sum((xyz - centroid) ** 2, -1)
        distance = jnp.minimum(distance, dist)
        farthest = jnp.argmax(distance, axis=-1).astype(jnp.int32)
        return distance, farthest, centroids

    distance = jnp.full((B, N), 1e10, dtype=jnp.float32)
    farthest = jnp.zeros((B,), dtype=jnp.int32)
    centroids = jnp.zeros((B, npoint), dtype=jnp.int32)
    _, _, centroids = jax.lax.fori_loop(0, npoint, body, (distance, farthest, centroids))
    return centroids


def query_ball_point(radius, nsample, xyz, new_xyz):
    B, N, _ = xyz.shape
    S = new_xyz.shape[1]
    sqrdists = square_distance(new_xyz, xyz)                       # [B, S, N]
    group_idx = jnp.broadcast_to(jnp.arange(N, dtype=jnp.int32), (B, S, N))
    group_idx = jnp.where(sqrdists > radius ** 2, jnp.int32(N), group_idx)
    group_idx = jnp.sort(group_idx, axis=-1)[:, :, :nsample]       # [B, S, K]
    group_first = jnp.broadcast_to(group_idx[:, :, 0:1], group_idx.shape)
    group_idx = jnp.where(group_idx == N, group_first, group_idx)
    return group_idx


def sample_and_group_kbs(npoint, radius, nsample, xyz, points):
    # xyz: [B, N, 3], points: [B, N, D] or None
    # returns new_xyz [B, S, 3], new_points [K, B, S, 3(+D)]  (K = nsample)
    fps_idx = farthest_point_sample(xyz, npoint)                   # [B, S]
    new_xyz = index_points(xyz, fps_idx)                           # [B, S, 3]
    idx = query_ball_point(radius, nsample, xyz, new_xyz)          # [B, S, K]
    grouped_xyz = index_points_kbs(xyz, idx)                       # [K, B, S, 3]
    grouped_xyz_norm = grouped_xyz - new_xyz[None, :, :, :]
    if points is not None:
        grouped_points = index_points_kbs(points, idx)             # [K, B, S, D]
        new_points = jnp.concatenate([grouped_xyz_norm, grouped_points], axis=-1)
    else:
        new_points = grouped_xyz_norm
    return new_xyz, new_points


def sample_and_group_all_kbs(xyz, points):
    # returns new_xyz [B, 1, 3], new_points [N, B, 1, 3(+D)]  (K = N, S = 1)
    B, N, C = xyz.shape
    new_xyz = jnp.zeros((B, 1, C), dtype=xyz.dtype)
    grouped_xyz = jnp.transpose(xyz, (1, 0, 2))[:, :, None, :]     # [N, B, 1, 3]
    if points is not None:
        grouped_pts = jnp.transpose(points, (1, 0, 2))[:, :, None, :]
        new_points = jnp.concatenate([grouped_xyz, grouped_pts], axis=-1)
    else:
        new_points = grouped_xyz
    return new_xyz, new_points


# ----------------------------------------------------------------------------
# Pallas kernels
# ----------------------------------------------------------------------------
def _stats_kernel(x_ref, *refs, n_prev, tile_rows, valid_rows, need_mask):
    """BN-statistics pass for layer `n_prev`.

    Recomputes layers 0..n_prev-1 (folded conv+BN+ReLU), then the layer-n_prev conv
    only, and accumulates per-channel sum / sum-of-squares into the resident output
    block across the K ("arbitrary") grid axis.  Nothing big is written to HBM.
    refs = [ (w_j, scale_j, shift_j) * n_prev, w_layer, stats_out ]
    """
    stats_ref = refs[-1]
    w_last_ref = refs[-2]
    k = pl.program_id(1)

    @pl.when(k == 0)
    def _init():
        stats_ref[...] = jnp.zeros_like(stats_ref)

    h = x_ref[...].astype(jnp.bfloat16)                            # [TR, C_in]
    for l in range(n_prev):
        w_ref = refs[3 * l]
        sc_ref = refs[3 * l + 1]
        sh_ref = refs[3 * l + 2]
        y = jnp.dot(h, w_ref[...], preferred_element_type=jnp.float32)
        h = jnp.maximum(y * sc_ref[...] + sh_ref[...], 0.0).astype(jnp.bfloat16)
    y = jnp.dot(h, w_last_ref[...], preferred_element_type=jnp.float32)  # [TR, C_pad]

    if need_mask:
        # Zero out padded rows so they do not pollute the statistics (the real row
        # count is used on the host when dividing by N).
        i = pl.program_id(0)
        row = jax.lax.broadcasted_iota(jnp.int32, y.shape, 0) + i * tile_rows
        y = jnp.where(row < valid_rows, y, 0.0)

    stats_ref[0:1, :] = stats_ref[0:1, :] + jnp.sum(y, axis=0, keepdims=True)
    stats_ref[1:2, :] = stats_ref[1:2, :] + jnp.sum(y * y, axis=0, keepdims=True)


def _apply_kernel(x_ref, *refs, n_layers):
    """Final pass: all layers as (bf16 matmul -> scale/shift FMA -> ReLU), fused with
    a running max over the K grid axis held in the resident output block.
    refs = [ (w_l, scale_l, shift_l) * n_layers, out ]
    """
    o_ref = refs[-1]
    k = pl.program_id(1)

    h = x_ref[...].astype(jnp.bfloat16)
    y = None
    for l in range(n_layers):
        w_ref = refs[3 * l]
        sc_ref = refs[3 * l + 1]
        sh_ref = refs[3 * l + 2]
        y = jnp.dot(h, w_ref[...], preferred_element_type=jnp.float32)
        y = jnp.maximum(y * sc_ref[...] + sh_ref[...], 0.0)        # folded BN + ReLU
        if l + 1 < n_layers:
            h = y.astype(jnp.bfloat16)

    @pl.when(k == 0)
    def _init():
        o_ref[...] = y

    @pl.when(k > 0)
    def _acc():
        o_ref[...] = jnp.maximum(o_ref[...], y)


def _pick_row_tile(bs):
    """Choose a row-tile (second-minor block dim) and the padded row count."""
    if bs <= _ROW_TILE_CAP:
        return bs, bs                                   # block == full dim, always legal
    for t in range(_ROW_TILE_CAP, 0, -16):              # multiples of 16 (bf16 sublanes)
        if bs % t == 0:
            return t, bs
    return 256, _round_up(bs, 256)


def run_mlp_max(x, layer_params, *, eps=_BN_EPS):
    """x: [K, B*S, C_in] (rows per K-slice ordered (b, s)); layer_params: list of
    (w_pad bf16 [C_prev, C_pad], gamma_pad f32 [C_pad], beta_pad f32 [C_pad]).
    Returns float32 [B*S, C_pad_last] = max over K of relu(bn(conv(...)))."""
    K, bs, c_in = x.shape
    tile_rows, bs_pad = _pick_row_tile(bs)
    if bs_pad != bs:
        x = jnp.pad(x, ((0, 0), (0, bs_pad - bs), (0, 0)))
    num_tiles = bs_pad // tile_rows
    need_mask = bs_pad != bs
    n_rows = K * bs                                     # real row count for BN stats

    x_spec = pl.BlockSpec((None, tile_rows, c_in), lambda i, k: (k, i, 0))
    grid = (num_tiles, K)
    cparams = pltpu.CompilerParams(
        dimension_semantics=("parallel", "arbitrary"),  # row tiles shard across cores
        vmem_limit_bytes=32 * 1024 * 1024,
    )

    def _full_spec(arr):
        nd = arr.ndim
        return pl.BlockSpec(arr.shape, lambda *args: (0,) * nd)

    # ---- per-layer statistics passes (sum & sum-of-squares, E[x^2]-E[x]^2 var) ----
    scales, shifts = [], []
    for l, (w, gamma, beta) in enumerate(layer_params):
        c_pad = w.shape[1]
        inputs = [x]
        for j in range(l):
            inputs += [layer_params[j][0], scales[j], shifts[j]]
        inputs.append(w)
        in_specs = [x_spec] + [_full_spec(a) for a in inputs[1:]]
        stats = pl.pallas_call(
            functools.partial(_stats_kernel, n_prev=l, tile_rows=tile_rows,
                              valid_rows=bs, need_mask=need_mask),
            grid=grid,
            in_specs=in_specs,
            out_specs=pl.BlockSpec((None, 8, c_pad), lambda i, k: (i, 0, 0)),
            out_shape=jax.ShapeDtypeStruct((num_tiles, 8, c_pad), jnp.float32),
            compiler_params=cparams,
        )(*inputs)
        tot = jnp.sum(stats, axis=0)                    # [8, c_pad]; rows 0/1 used
        mean = tot[0] / n_rows
        var = jnp.maximum(tot[1] / n_rows - mean * mean, 0.0)   # biased var (BN train)
        scale = gamma * jax.lax.rsqrt(var + eps)
        shift = beta - mean * scale                     # conv bias exactly cancelled
        scales.append(scale.reshape(1, c_pad).astype(jnp.float32))
        shifts.append(shift.reshape(1, c_pad).astype(jnp.float32))

    # ---- final apply pass fused with the max over K (single lane-dense write) ----
    inputs = [x]
    for l, (w, _, _) in enumerate(layer_params):
        inputs += [w, scales[l], shifts[l]]
    in_specs = [x_spec] + [_full_spec(a) for a in inputs[1:]]
    c_last = layer_params[-1][0].shape[1]
    out = pl.pallas_call(
        functools.partial(_apply_kernel, n_layers=len(layer_params)),
        grid=grid,
        in_specs=in_specs,
        out_specs=pl.BlockSpec((tile_rows, c_last), lambda i, k: (i, 0)),
        out_shape=jax.ShapeDtypeStruct((bs_pad, c_last), jnp.float32),
        compiler_params=cparams,
    )(*inputs)
    return out[:bs, :]


# ----------------------------------------------------------------------------
# PointNetSetAbstraction module (JAX / Pallas)
# ----------------------------------------------------------------------------
class PointNetSetAbstraction:
    def __init__(self, npoint, radius, nsample, in_channel, mlp, group_all, key,
                 synchronization="BN"):
        if synchronization == "Instance":
            # TODO(synk): InstanceNorm2d variant (per-sample stats) is not implemented.
            raise NotImplementedError("Only 'BN' / 'BN_syn' (batch-norm) are implemented.")
        self.npoint = npoint
        self.radius = radius
        self.nsample = nsample
        self.group_all = group_all
        self.in_channel = in_channel
        self.out_channels = mlp[-1]

        # Raw parameters mirroring Conv2d(1x1) + BatchNorm2d.  The conv bias is kept
        # for parameter parity but train-mode BN cancels it exactly, so the kernels
        # never touch it (no dead per-element work).
        # TODO(synk): BN running_mean/running_var side-effect updates are not produced.
        self.layers = []
        last = in_channel
        for out_ch in mlp:
            key, k_w, k_b = jax.random.split(key, 3)
            w = jax.random.normal(k_w, (last, out_ch), jnp.float32) * 0.1
            b = jax.random.normal(k_b, (out_ch,), jnp.float32) * 0.01   # unused (folded)
            gamma = jnp.ones((out_ch,), jnp.float32)
            beta = jnp.zeros((out_ch,), jnp.float32)
            self.layers.append((w, b, gamma, beta))
            last = out_ch

        # Kernel-side parameters: output channels padded to a lane-dense multiple of
        # 128 (padded gammas are 0 so padded channels stay exactly 0 everywhere),
        # weights stored [in, out] in bf16 for the MXU.  Input channels stay unpadded
        # (padding them would only inflate HBM traffic).
        self.kernel_params = []
        prev = in_channel
        for (w, b, gamma, beta) in self.layers:
            c_out = w.shape[1]
            c_pad = _round_up(c_out, _LANE)
            w_pad = jnp.zeros((prev, c_pad), jnp.float32).at[:w.shape[0], :c_out].set(w)
            g_pad = jnp.zeros((c_pad,), jnp.float32).at[:c_out].set(gamma)
            b_pad = jnp.zeros((c_pad,), jnp.float32).at[:c_out].set(beta)
            self.kernel_params.append((w_pad.astype(jnp.bfloat16), g_pad, b_pad))
            prev = c_pad

    def __call__(self, xyz, points):
        """xyz: [B, 3, N]; points: [B, D, N] or None.
        Returns new_xyz [B, 3, S], new_points [B, mlp[-1], S]."""
        xyz_t = jnp.transpose(xyz, (0, 2, 1))                      # [B, N, 3]
        points_t = None if points is None else jnp.transpose(points, (0, 2, 1))

        if self.group_all:
            new_xyz, new_points = sample_and_group_all_kbs(xyz_t, points_t)
        else:
            new_xyz, new_points = sample_and_group_kbs(
                self.npoint, self.radius, self.nsample, xyz_t, points_t)
        # new_points: [K, B, S, C_in] -- already in kernel layout (no slab transpose).
        K, B, S, C_in = new_points.shape
        x = new_points.reshape(K, B * S, C_in).astype(jnp.bfloat16)

        out = run_mlp_max(x, self.kernel_params)                   # [B*S, C_pad] f32
        out = out[:, : self.out_channels].reshape(B, S, self.out_channels)
        new_points_out = jnp.transpose(out, (0, 2, 1))             # [B, C', S]
        new_xyz_out = jnp.transpose(new_xyz, (0, 2, 1))            # [B, 3, S]
        return new_xyz_out, new_points_out


# ----------------------------------------------------------------------------
if __name__ == "__main__":
    key = jax.random.PRNGKey(0)
    k_xyz, k_pts, k_param = jax.random.split(key, 3)

    B, N, D = 2, 16, 4           # batch, points, feature channels
    npoint, radius, nsample = 8, 0.4, 8
    mlp = [16, 32]
    in_channel = D + 3           # features concatenated with normalized xyz

    xyz = jax.random.uniform(k_xyz, (B, 3, N), jnp.float32)        # [B, 3, N]
    points = jax.random.normal(k_pts, (B, D, N), jnp.float32)      # [B, D, N]

    sa = PointNetSetAbstraction(npoint, radius, nsample, in_channel, mlp,
                                group_all=False, key=k_param)
    new_xyz, new_points = sa(xyz, points)
    jax.block_until_ready((new_xyz, new_points))

    assert new_xyz.shape == (B, 3, npoint), new_xyz.shape
    assert new_points.shape == (B, mlp[-1], npoint), new_points.shape
    assert bool(jnp.all(jnp.isfinite(new_points)))
    print("KERNEL_OK")
</pallas_src>

<mosaic_0001>
module attributes {stable_mosaic.version = 11 : i64} {
  func.func @_stats_kernel(%arg0: i32, %arg1: i32, %arg2: memref<1x16x7xbf16, #tpu.memory_space<vmem>>, %arg3: memref<7x128xbf16, #tpu.memory_space<vmem>>, %arg4: memref<1x8x128xf32, #tpu.memory_space<vmem>>) attributes {dimension_semantics = [#tpu.dimension_semantics<parallel>, #tpu.dimension_semantics<arbitrary>], iteration_bounds = array<i64: 1, 8>, scalar_prefetch = 0 : i64, scratch_operands = 0 : i64, tpu.core_type = #tpu.core_type<tc>, window_params = [{transform_indices = @transform_0, window_bounds = array<i64: 1, 16, 7>}, {pipeline_mode = #tpu.pipeline_mode<synchronous>, transform_indices = @transform_1, window_bounds = array<i64: 7, 128>}, {transform_indices = @transform_2, window_bounds = array<i64: 1, 8, 128>}]} {
    %c0_i32 = arith.constant 0 : i32
    %0 = arith.cmpi eq, %arg1, %c0_i32 : i32
    %1 = arith.extui %0 : i1 to i32
    %c0_i32_0 = arith.constant 0 : i32
    %2 = arith.cmpi ne, %1, %c0_i32_0 : i32
    scf.if %2 {
      %cst_18 = arith.constant 0.000000e+00 : f32
      %24 = vector.broadcast %cst_18 : f32 to vector<8x128xf32>
      %c0_19 = arith.constant 0 : index
      %c0_20 = arith.constant 0 : index
      %c0_21 = arith.constant 0 : index
      %25 = vector.load %arg4[%c0_19, %c0_20, %c0_21] : memref<1x8x128xf32, #tpu.memory_space<vmem>>, vector<1x8x128xf32>
      %26 = vector.shape_cast %25 : vector<1x8x128xf32> to vector<8x128xf32>
      %27 = vector.shape_cast %24 : vector<8x128xf32> to vector<1x8x128xf32>
      tpu.vector_store %arg4[%c0_19, %c0_20, %c0_21], %27 {strides = array<i32>} : memref<1x8x128xf32, #tpu.memory_space<vmem>>, vector<1x8x128xf32>,
    } else {
    }
    %c0 = arith.constant 0 : index
    %c0_1 = arith.constant 0 : index
    %c0_2 = arith.constant 0 : index
    %3 = vector.load %arg2[%c0, %c0_1, %c0_2] : memref<1x16x7xbf16, #tpu.memory_space<vmem>>, vector<1x16x7xbf16>
    %4 = vector.shape_cast %3 : vector<1x16x7xbf16> to vector<16x7xbf16>
    %c0_3 = arith.constant 0 : index
    %c0_4 = arith.constant 0 : index
    %5 = vector.load %arg3[%c0_3, %c0_4] : memref<7x128xbf16, #tpu.memory_space<vmem>>, vector<7x128xbf16>
    %cst = arith.constant dense<0.000000e+00> : vector<16x128xf32>
    %6 = tpu.matmul %4, %5, %cst {dimension_numbers = #tpu.dot_dimension_numbers<[1], [0], [0], [1], [0, 0, 1, 1], [], []>} : vector<16x7xbf16>, vector<7x128xbf16>, vector<16x128xf32> -> vector<16x128xf32>
    %c0_5 = arith.constant 0 : index
    %c0_6 = arith.constant 0 : index
    %c0_7 = arith.constant 0 : index
    %7 = vector.load %arg4[%c0_5, %c0_6, %c0_7] : memref<1x8x128xf32, #tpu.memory_space<vmem>>, vector<1x1x128xf32>
    %8 = vector.shape_cast %7 : vector<1x1x128xf32> to vector<1x128xf32>
    %cst_8 = arith.constant dense<0.000000e+00> : vector<128xf32>
    %9 = vector.multi_reduction <add>, %6, %cst_8 [0] : vector<16x128xf32> to vector<128xf32>
    %10 = vector.shape_cast %9 : vector<128xf32> to vector<1x128xf32>
    %11 = arith.addf %8, %10 : vector<1x128xf32>
    %c0_9 = arith.constant 0 : index
    %c0_10 = arith.constant 0 : index
    %c0_11 = arith.constant 0 : index
    %12 = vector.load %arg4[%c0_9, %c0_10, %c0_11] : memref<1x8x128xf32, #tpu.memory_space<vmem>>, vector<1x1x128xf32>
    %13 = vector.shape_cast %12 : vector<1x1x128xf32> to vector<1x128xf32>
    %14 = vector.shape_cast %11 : vector<1x128xf32> to vector<1x1x128xf32>
    tpu.vector_store %arg4[%c0_9, %c0_10, %c0_11], %14 {strides = array<i32>} : memref<1x8x128xf32, #tpu.memory_space<vmem>>, vector<1x1x128xf32>,
    %c0_12 = arith.constant 0 : index
    %c1 = arith.constant 1 : index
    %c0_13 = arith.constant 0 : index
    %15 = vector.load %arg4[%c0_12, %c1, %c0_13] : memref<1x8x128xf32, #tpu.memory_space<vmem>>, vector<1x1x128xf32>
    %16 = vector.shape_cast %15 : vector<1x1x128xf32> to vector<1x128xf32>
    %17 = arith.mulf %6, %6 : vector<16x128xf32>
    %cst_14 = arith.constant dense<0.000000e+00> : vector<128xf32>
    %18 = vector.multi_reduction <add>, %17, %cst_14 [0] : vector<16x128xf32> to vector<128xf32>
    %19 = vector.shape_cast %18 : vector<128xf32> to vector<1x128xf32>
    %20 = arith.addf %16, %19 : vector<1x128xf32>
    %c0_15 = arith.constant 0 : index
    %c1_16 = arith.constant 1 : index
    %c0_17 = arith.constant 0 : index
    %21 = vector.load %arg4[%c0_15, %c1_16, %c0_17] : memref<1x8x128xf32, #tpu.memory_space<vmem>>, vector<1x1x128xf32>
    %22 = vector.shape_cast %21 : vector<1x1x128xf32> to vector<1x128xf32>
    %23 = vector.shape_cast %20 : vector<1x128xf32> to vector<1x1x128xf32>
    tpu.vector_store %arg4[%c0_15, %c1_16, %c0_17], %23 {strides = array<i32>} : memref<1x8x128xf32, #tpu.memory_space<vmem>>, vector<1x1x128xf32>,
    return
  }
  func.func @transform_0(%arg0: i32, %arg1: i32) -> (i32, i32, i32) {
    %c0_i32 = arith.constant 0 : i32
    %c0_i32_0 = arith.constant 0 : i32
    return %arg1, %arg0, %c0_i32 : i32, i32, i32
  }
  func.func @transform_1(%arg0: i32, %arg1: i32) -> (i32, i32) {
    %c0_i32 = arith.constant 0 : i32
    %c0_i32_0 = arith.constant 0 : i32
    %c0_i32_1 = arith.constant 0 : i32
    return %c0_i32, %c0_i32_0 : i32, i32
  }
  func.func @transform_2(%arg0: i32, %arg1: i32) -> (i32, i32, i32) {
    %c0_i32 = arith.constant 0 : i32
    %c0_i32_0 = arith.constant 0 : i32
    %c0_i32_1 = arith.constant 0 : i32
    return %arg0, %c0_i32, %c0_i32_0 : i32, i32, i32
  }
}

</mosaic_0001>

<bundles_post_ra>
// kernel: tpu_custom_call.1
= control target key start
LH: loop header
LB: loop body
LE: loop exit
PB: predicated region body
PF: predicated region fallthrough
CT: control target
= control target key end

     0   :  { %7 = vsyncpa [#allocation3], 0  ;;  %s448_s9 = smov 0   ;;  %s450_s10 = smov 0   ;;  %s510_s0 = inlined_call_operand.vmem [shape: bf16[8,16,7], index: 0, kind: input, shape index: {}]   ;;  %s511_s1 = inlined_call_operand.vmem [shape: bf16[7,128], index: 1, kind: input, shape index: {}]   ;;  %s512_s2 = inlined_call_operand.hbm [shape: f32[1,8,128], index: 2, kind: output, shape index: {}]  }
   0x1   :  { %s452_s11 = smov 0  }
   0x2 LB: > { %s316_s12 = sadd.s32 4294967295, %s426_s11   ;;  %s22_s13 = sadd.s32 1, %s422_s10  ;;  %s426_s11 = sphi %s452_s11, %s13_s11   ;;  %s422_s10 = sphi %s450_s10, %s515_s10   ;;  %s418_s9 = sphi %s448_s9, %s514_s9  }
   0x3   : > { %p23_p0 = scmp.ge.s32.totalorder %s22_s13, 8  ;;  %p319_p1 = scmp.ge.s32.totalorder %s426_s11, 1 }
   0x4   : > { %p132_p2 = scmp.lt.s32.totalorder %s426_s11, 9 }
   0x5   : > { %s517_s13 = smov (%p23_p0, %s22_s13), 0 }
   0x6   : > { %p133_p3 = pnand %p319_p1, %p132_p2 }
   0x7   : > { %p154_p4 = scmp.lt.s32.totalorder (!%p133_p3), %s418_s9, 7  ;;  %p322_p5 = scmp.ne.s32.totalorder (!%p133_p3), %s418_s9, 0 }
   0x8   : > { %136 = sbr.rel (%p133_p3) target bundleno = 278 (0x116), region = 28 }
   0xf   : > { %s155_s14 = scalar_select %p154_p4, %s418_s9, 7 }
  0x10   : > { %167 = sbr.rel (%p322_p5) target bundleno = 23 (0x17), region = 32  ;;  %v428_v0 = vmov (!%p322_p5), 0.0  }
  0x11   : > { %s329_s15 = sshll.u32 %s155_s14, 3  ;;  %168 = vst [vmem:[#allocation2] sm:$0xff] (!%p322_p5), %v428_v0 }
  0x12   : > { %s161_s18 = scalar_lea.vmem %s510_s0, %s329_s15 }
  0x17 PF: > { %v171_v1 = vld [vmem:[%s511_s1] sm:$0xf]  ;;  %vm181_vm0 = vcmask 1042432   ;;  %vm182_vm1 = vcmask 1043456   ;;  %v429_v2 = vmov 0.0   ;;  %v430_v3 = vmov 65535  }
  0x18   : > { %332 = vmatprep.subr.bf16.mxu0 %v429_v2  ;;  %v183_v4 = vsel %vm181_vm0, 4294967295, %v430_v3  ;;  %vm431_vm2 = vmmov 0   ;;  %v373_v7 = vld [vmem:[%s161_s18] sm:$0xff]   ;;  %vm177_vm3 = vcmask 56320   ;;  %s432_s21 = smov [#allocation2]   ;;  %p475_p6 = scmp.eq.s32.totalorder %s316_s12, 7 }
  0x19   : > { %v184_v5 = vsel %vm182_vm1, %v183_v4, 0  ;;  %334 = vmatprep.mubr.msk.bf16.mxu0 %vm431_vm2, %v429_v2  ;;  %v229_v25 = vld [vmem:[#allocation2] sm:$0x1]  ;;  %v239_v28 = vld [vmem:[#allocation2 + $0x1] sm:$0x1]  ;;  %s260_s22 = sshll.u32 %s432_s21, 4  ;;  %s261_s22 = int_to_ptr.vmem [resolvable:$true] %s260_s22 }
  0x1a   : > { %v186_v6 = vand.u32 %v184_v5, %v171_v1  ;;  %s374_s24 = scalar_lea.vmem %s261_s22, 128  ;;  %p381_p10 = scmp.lt.s32.totalorder %s261_s22, %s261_s22 }
  0x1b   : > { %p375_p7 = scmp.ne.s32.totalorder %s261_s22, %s374_s24  ;;  %p382_p11 = scmp.lt.s32.totalorder %s374_s24, %s374_s24 }
  0x1c   : > { %333 = vmatpush3.bf16.msra.mxu0 %v186_v6 }
  0x1d   : > { %p376_p8 = pnand %p375_p7, %p475_p6  ;;  %p383_p12 = por %p382_p11, %p381_p10 }
  0x1f   : > { %335 = vmatmul.mubr.msk.bf16.vlgmr.msra.gmra.mrb[0].mxu0 %vm177_vm3, %v373_v7  ;;  %p377_p9 = pneg %p376_p8 }
  0x21   : > { %p384_p13 = pnand %p383_p12, %p377_p9 }
  0xf2   : > { %v222_v8 = vpop.f32.mrb[0].mxu0 }
  0xf3   : > { %v336_v9 = vpop.f32.mrb[1].mxu0  ;;  %v240_v11 = vmul.f32 %v222_v8, %v222_v8 }
  0xf4   : > { %v225_v10 = vpop.f32.mrb[2].mxu0 }
  0xf5   : > { %v230_v12 = vadd.f32 %v225_v10, %v222_v8  ;;  %v241_v13 = vmul.f32 %v225_v10, %v225_v10  ;;  %v337_v14 = vpop.f32.mrb[3].mxu0 }
  0xf7   : > { %v231_v15 = vrot.slane %v230_v12, 4  ;;  %v242_v16 = vadd.f32 %v241_v13, %v240_v11 }
  0xf9   : > { %v232_v17 = vadd.f32 %v231_v15, %v230_v12  ;;  %v243_v18 = vrot.slane %v242_v16, 4 }
  0xfb   : > { %v233_v19 = vrot.slane %v232_v17, 2  ;;  %v244_v20 = vadd.f32 %v243_v18, %v242_v16 }
  0xfd   : > { %v234_v21 = vadd.f32 %v233_v19, %v232_v17  ;;  %v245_v22 = vrot.slane %v244_v20, 2 }
  0xff   : > { %v235_v23 = vrot.slane %v234_v21, 1  ;;  %v246_v24 = vadd.f32 %v245_v22, %v244_v20 }
 0x101   : > { %v236_v26 = vadd.f32 %v235_v23, %v234_v21  ;;  %v247_v27 = vrot.slane %v246_v24, 1 }
 0x103   : > { %v237_v29 = vadd.f32 %v236_v26, %v229_v25  ;;  %v248_v30 = vadd.f32 %v247_v27, %v246_v24 }
 0x105   : > { %238 = vst [vmem:[#allocation2] sm:$0x1] %v237_v29  ;;  %v249_v31 = vadd.f32 %v248_v30, %v239_v28 }
 0x107   : > { %250 = vst [vmem:[#allocation2 + $0x1] sm:$0x1] %v249_v31 }
 0x108   : > { %387 = shalt.err (!%p384_p13)
}
 0x109   : > { %s388_s27 = scalar_lea.hbm %s512_s2, 128 }
 0x10a   : > { %p389_p0 = scmp.ne.s32.totalorder %s512_s2, %s388_s27  ;;  %p394_p3 = scmp.lt.u32.totalorder %s388_s27, %s512_s2 }
 0x10c   : > { %p390_p1 = pnand %p389_p0, %p475_p6 }
 0x10e   : > { %p391_p2 = pneg %p390_p1 }
 0x110   : > { %p396_p4 = pnand %p394_p3, %p391_p2 }
 0x112   : > { %399 = shalt.err (!%p396_p4)
}
 0x113   : > { %339 = dma.vmem_to_hbm [thread:$0]  (%p475_p6), %s261_s22, 128, %s512_s2, [#allocation3]  }
 0x114   : > { %413 = dma.done.wait (%p475_p6), [#allocation3], 128  }
 0x115   : > { %415 = vsyncadd (%p475_p6), [#allocation3], 4294967168 }
 0x116 PF: > { %s13_s11 = sadd.s32 1, %s426_s11   ;;  %s514_s9 = smov %s422_s10 }
 0x117   : > { %p10_p5 = scmp.ge.s32.totalorder %s13_s11, 10   ;;  %s515_s10 = smov %s517_s13 }
 0x119   :  { %12 = sbr.rel (!%p10_p5) target bundleno = 2 (0x2), region = 60 }
 0x120   :  { %273 = vsyncpa [#allocation3], 1 }
 0x121   :  { %275 = vsyncpa [#allocation3 + $0x1], 1 }

</bundles_post_ra>
